<compile_context>
chip_gen: v5e
topology: v5e:2x2
jax: 0.10.0
libtpu: 0.0.40
codegen_flags: <defaults>
</compile_context>

<pallas_src>
import jax
import jax.numpy as jnp
import numpy as np
from jax.experimental import pallas as pl
from jax.experimental.pallas import tpu as pltpu


def _gaussian_1d(kernel_size: int, sigma: float) -> np.ndarray:
    """Normalized 1-D Gaussian, matching SSIM.CreateGuassianKernel's 1-D factor."""
    xs = np.arange(kernel_size, dtype=np.float64)
    g = np.exp(-((xs - kernel_size // 2) ** 2) / (2.0 * float(sigma) ** 2))
    return (g / g.sum()).astype(np.float32)


def _band_matrix(n: int, g: np.ndarray) -> np.ndarray:
    """(n, n) band matrix M with M[i, i+d] = g[d+P].

    M @ x performs the zero-padded 'same' 1-D convolution of x along its
    leading axis (symmetric Gaussian, so M == M.T)."""
    k = g.shape[0]
    p = k // 2
    m = np.zeros((n, n), dtype=np.float32)
    for d in range(-p, p + 1):
        if abs(d) < n:
            m += g[d + p] * np.eye(n, k=d, dtype=np.float32)
    return m


def _ssim_kernel(c_ref, bh2_ref, bh3_ref, bw_ref, img1_ref, img2_ref, out_ref):
    """One grid step = a block of bb images.

    c_ref   : SMEM (2,)        -> [C1, C2]
    bh2_ref : VMEM (2R, 2R)    -> I_{2*bb} (x) band_h   (resident, phase 1)
    bh3_ref : VMEM (3R, 3R)    -> I_{3*bb} (x) band_h   (resident, phase 2)
    bw_ref  : VMEM (W, W)      -> horizontal Gaussian band (resident)
    img1_ref: VMEM (bb, H, W)
    img2_ref: VMEM (bb, H, W)
    out_ref : SMEM (1, 1)      -> sum of ssim_map over this block
    """
    C1 = c_ref[0]
    C2 = c_ref[1]
    bw = bw_ref[...]                                   # (W, W)
    bb, H, W = img1_ref.shape
    R = bb * H

    # Collapse batch into the row (sublane) axis: free reshape, W stays on lanes.
    x1 = img1_ref[...].reshape(R, W)
    x2 = img2_ref[...].reshape(R, W)

    def sep_conv(planes, bh_big):
        # Batched separable 'same' Gaussian conv over k stacked planes:
        #   W-direction: one (k*R, W) x (W, W) MXU matmul,
        #   H-direction: one (k*R, k*R) x (k*R, W) MXU matmul with a
        #   block-diagonal band (no cross-plane / cross-image mixing).
        stack = jnp.concatenate(planes, axis=0)                         # (k*R, W)
        t = jnp.dot(stack, bw, preferred_element_type=jnp.float32)      # conv along W
        return jnp.dot(bh_big, t, preferred_element_type=jnp.float32)   # conv along H

    # Phase 1: means.
    mu = sep_conv([x1, x2], bh2_ref[...])              # (2R, W)
    mu1 = mu[:R]
    mu2 = mu[R:]
    d1 = x1 - mu1
    d2 = x2 - mu2

    # Phase 2: (co)variances.
    s = sep_conv([d1 * d1, d2 * d2, d1 * d2], bh3_ref[...])   # (3R, W)
    s11 = s[:R] + 1.0            # sigma1_sq + 1
    s22 = s[R:2 * R] + 1.0       # sigma2_sq + 1
    s12 = s[2 * R:] + 1.0        # sigma1sigma2 + 1

    mu1mu2 = mu1 * mu2 + 1.0
    mu_sq_sum = (mu1 * mu1 + 1.0) + (mu2 * mu2 + 1.0)

    # structure * brightness fused into a single ratio (one divide per element).
    num = (2.0 * s12 + C2) * ((2.0 * mu1mu2) ** 2 + C1)
    den = (s11 + s22 + C2) * (mu_sq_sum ** 2 + C1)
    out_ref[0, 0] = jnp.sum(num / den)


def _pick_block_batch(B, H, W, vmem_budget):
    """Largest divisor of B whose per-step working set fits the VMEM budget."""
    best = 1
    for bb in range(1, B + 1):
        if B % bb:
            continue
        plane = bb * H * W * 4
        bands = ((2 * bb * H) ** 2 + (3 * bb * H) ** 2 + W * W) * 4
        need = (2 * 2) * plane + 14 * plane + 2 * bands   # dbl-buffered inputs + temps + bands
        if 3 * bb * H <= 2048 and need <= vmem_budget:
            best = bb
    return best


def ssim_loss(img1, img2, kernel_size: int = 11, sigma=None):
    """Equivalent of SSIM.forward(img1, img2, valid_mask=None) -> scalar loss."""
    if sigma is None:
        sigma = 1 if kernel_size == 1 else (kernel_size - 1) * 2.0
    # TODO(synk): ErodeValidMask (cv2-based) path for valid_mask != None is not
    # translated; only the valid_mask=None path (all-ones mask) is implemented.

    B, C, H, W = img1.shape
    assert C == 1, "module's conv2d uses a (1,1,k,k) kernel with groups=1 -> C must be 1"

    x1 = img1.reshape(B, H, W).astype(jnp.float32)
    x2 = img2.reshape(B, H, W).astype(jnp.float32)

    # Single fused reduction pass for val_range (each input read from HBM once).
    val_range = (jnp.max(jnp.maximum(x1, x2))
                 - jnp.min(jnp.minimum(x1, x2)) + 1e-05)
    C1 = (0.01 * val_range) ** 2
    C2 = (0.03 * val_range) ** 2
    c = jnp.stack([C1, C2]).astype(jnp.float32)        # (2,)

    # Generation-aware VMEM budget (v7x: 64 MiB/TC vs 128 MiB on v5e/v6e).
    try:
        vmem_cap = int(getattr(pltpu.get_tpu_info(), "vmem_capacity_bytes", 64 << 20))
    except Exception:
        vmem_cap = 64 << 20

    bb = _pick_block_batch(B, H, W, vmem_budget=vmem_cap // 3)
    n_steps = B // bb
    R = bb * H

    # Static (trace-time) Gaussian band matrices -> no in-kernel weight loads.
    g = _gaussian_1d(kernel_size, sigma)
    band_h = _band_matrix(H, g)
    band_w = _band_matrix(W, g)                         # symmetric -> equals its transpose
    bh2 = jnp.asarray(np.kron(np.eye(2 * bb, dtype=np.float32), band_h))  # (2R, 2R)
    bh3 = jnp.asarray(np.kron(np.eye(3 * bb, dtype=np.float32), band_h))  # (3R, 3R)
    bw = jnp.asarray(band_w.T)                                            # (W, W)

    vmem_need = ((2 * 2 + 14) * bb * H * W * 4
                 + 2 * ((2 * R) ** 2 + (3 * R) ** 2 + W * W) * 4)
    vmem_limit = int(min(max(2 * vmem_need, 32 << 20), int(0.85 * vmem_cap)))

    per_step_sums = pl.pallas_call(
        _ssim_kernel,
        out_shape=jax.ShapeDtypeStruct((n_steps, 1), jnp.float32),
        grid=(n_steps,),
        in_specs=[
            pl.BlockSpec(memory_space=pltpu.SMEM),               # [C1, C2]
            pl.BlockSpec((2 * R, 2 * R), lambda b: (0, 0)),      # resident band, phase 1
            pl.BlockSpec((3 * R, 3 * R), lambda b: (0, 0)),      # resident band, phase 2
            pl.BlockSpec((W, W), lambda b: (0, 0)),              # horizontal band
            pl.BlockSpec((bb, H, W), lambda b: (b, 0, 0)),       # img1 block
            pl.BlockSpec((bb, H, W), lambda b: (b, 0, 0)),       # img2 block
        ],
        out_specs=pl.BlockSpec((1, 1), lambda b: (b, 0), memory_space=pltpu.SMEM),
        compiler_params=pltpu.CompilerParams(
            dimension_semantics=("parallel",),                   # image blocks are independent
            vmem_limit_bytes=vmem_limit,
        ),
    )(c, bh2, bh3, bw, x1, x2)

    # Final mean over all B*H*W elements (valid_mask is all-True).
    ssim_mean = jnp.sum(per_step_sums) / (B * H * W)
    return 1.0 - ssim_mean


def _ssim_loss_reference(img1, img2, kernel_size: int = 11, sigma=None):
    """Pure-JAX reference mirroring the PyTorch forward, for verification."""
    if sigma is None:
        sigma = 1 if kernel_size == 1 else (kernel_size - 1) * 2.0
    pad = kernel_size // 2
    g = _gaussian_1d(kernel_size, sigma)
    kw = jnp.asarray(np.outer(g, g))[None, None]  # (1,1,k,k) OIHW

    def conv(x):  # x: (B,1,H,W)
        return jax.lax.conv_general_dilated(
            x, kw, window_strides=(1, 1), padding=[(pad, pad), (pad, pad)],
            dimension_numbers=("NCHW", "OIHW", "NCHW"))

    x1 = img1.astype(jnp.float32)
    x2 = img2.astype(jnp.float32)
    val_range = (jnp.maximum(jnp.max(x1), jnp.max(x2))
                 - jnp.minimum(jnp.min(x1), jnp.min(x2)) + 1e-05)
    mu1, mu2 = conv(x1), conv(x2)
    mu1_sq, mu2_sq, mu1mu2 = mu1**2 + 1, mu2**2 + 1, mu1 * mu2 + 1
    s1 = conv((x1 - mu1) * (x1 - mu1)) + 1
    s2 = conv((x2 - mu2) * (x2 - mu2)) + 1
    s12 = conv((x1 - mu1) * (x2 - mu2)) + 1
    C1 = (0.01 * val_range) ** 2
    C2 = (0.03 * val_range) ** 2
    structure = (2.0 * s12 + C2) / (s1 + s2 + C2)
    brightness = ((2 * mu1mu2) ** 2 + C1) / ((mu1_sq + mu2_sq) ** 2 + C1)
    return 1.0 - jnp.mean(structure * brightness)


if __name__ == "__main__":
    key = jax.random.PRNGKey(0)
    k1, k2 = jax.random.split(key)
    B, C, H, W = 2, 1, 16, 16
    img1 = jax.random.uniform(k1, (B, C, H, W), dtype=jnp.float32)
    img2 = jax.random.uniform(k2, (B, C, H, W), dtype=jnp.float32)

    loss = jax.block_until_ready(ssim_loss(img1, img2))
    ref = jax.block_until_ready(_ssim_loss_reference(img1, img2))

    assert np.isfinite(float(loss)), "loss is not finite"
    assert abs(float(loss) - float(ref)) < 1e-3, (float(loss), float(ref))
    print("KERNEL_OK")
</pallas_src>

<mosaic_0001>
module attributes {stable_mosaic.version = 11 : i64} {
  func.func @_ssim_kernel(%arg0: i32, %arg1: memref<2xf32, #tpu.memory_space<smem>>, %arg2: memref<64x64xf32, #tpu.memory_space<vmem>>, %arg3: memref<96x96xf32, #tpu.memory_space<vmem>>, %arg4: memref<16x16xf32, #tpu.memory_space<vmem>>, %arg5: memref<2x16x16xf32, #tpu.memory_space<vmem>>, %arg6: memref<2x16x16xf32, #tpu.memory_space<vmem>>, %arg7: memref<1x1xf32, #tpu.memory_space<smem>>) attributes {dimension_semantics = [#tpu.dimension_semantics<parallel>], iteration_bounds = array<i64: 1>, scalar_prefetch = 0 : i64, scratch_operands = 0 : i64, tpu.core_type = #tpu.core_type<tc>, window_params = [{transform_indices = @transform_0, window_bounds = array<i64: 2>}, {pipeline_mode = #tpu.pipeline_mode<synchronous>, transform_indices = @transform_1, window_bounds = array<i64: 64, 64>}, {pipeline_mode = #tpu.pipeline_mode<synchronous>, transform_indices = @transform_2, window_bounds = array<i64: 96, 96>}, {pipeline_mode = #tpu.pipeline_mode<synchronous>, transform_indices = @transform_3, window_bounds = array<i64: 16, 16>}, {transform_indices = @transform_4, window_bounds = array<i64: 2, 16, 16>}, {transform_indices = @transform_5, window_bounds = array<i64: 2, 16, 16>}, {transform_indices = @transform_6, window_bounds = array<i64: 1, 1>}]} {
    %c0 = arith.constant 0 : index
    %0 = memref.load %arg1[%c0] : memref<2xf32, #tpu.memory_space<smem>>
    %c1 = arith.constant 1 : index
    %1 = memref.load %arg1[%c1] : memref<2xf32, #tpu.memory_space<smem>>
    %c0_0 = arith.constant 0 : index
    %c0_1 = arith.constant 0 : index
    %2 = vector.load %arg4[%c0_0, %c0_1] : memref<16x16xf32, #tpu.memory_space<vmem>>, vector<16x16xf32>
    %c0_2 = arith.constant 0 : index
    %c0_3 = arith.constant 0 : index
    %c0_4 = arith.constant 0 : index
    %3 = vector.load %arg5[%c0_2, %c0_3, %c0_4] : memref<2x16x16xf32, #tpu.memory_space<vmem>>, vector<2x16x16xf32>
    %4 = vector.shape_cast %3 : vector<2x16x16xf32> to vector<32x16xf32>
    %c0_5 = arith.constant 0 : index
    %c0_6 = arith.constant 0 : index
    %c0_7 = arith.constant 0 : index
    %5 = vector.load %arg6[%c0_5, %c0_6, %c0_7] : memref<2x16x16xf32, #tpu.memory_space<vmem>>, vector<2x16x16xf32>
    %6 = vector.shape_cast %5 : vector<2x16x16xf32> to vector<32x16xf32>
    %c0_8 = arith.constant 0 : index
    %c0_9 = arith.constant 0 : index
    %7 = vector.load %arg2[%c0_8, %c0_9] : memref<64x64xf32, #tpu.memory_space<vmem>>, vector<64x64xf32>
    %8 = tpu.concatenate %4, %6 in 0 : vector<32x16xf32>, vector<32x16xf32> -> vector<64x16xf32>
    %cst = arith.constant dense<0.000000e+00> : vector<64x16xf32>
    %9 = tpu.matmul %8, %2, %cst {dimension_numbers = #tpu.dot_dimension_numbers<[1], [0], [0], [1], [0, 0, 1, 1], [], []>} : vector<64x16xf32>, vector<16x16xf32>, vector<64x16xf32> -> vector<64x16xf32>
    %cst_10 = arith.constant dense<0.000000e+00> : vector<64x16xf32>
    %10 = tpu.matmul %7, %9, %cst_10 {dimension_numbers = #tpu.dot_dimension_numbers<[1], [0], [0], [1], [0, 0, 1, 1], [], []>} : vector<64x64xf32>, vector<64x16xf32>, vector<64x16xf32> -> vector<64x16xf32>
    %11 = vector.extract_strided_slice %10 {offsets = [0, 0], sizes = [32, 16], strides = [1, 1]} : vector<64x16xf32> to vector<32x16xf32>
    %12 = vector.extract_strided_slice %10 {offsets = [32, 0], sizes = [32, 16], strides = [1, 1]} : vector<64x16xf32> to vector<32x16xf32>
    %13 = arith.subf %4, %11 : vector<32x16xf32>
    %14 = arith.subf %6, %12 : vector<32x16xf32>
    %15 = arith.mulf %13, %13 : vector<32x16xf32>
    %16 = arith.mulf %14, %14 : vector<32x16xf32>
    %17 = arith.mulf %13, %14 : vector<32x16xf32>
    %c0_11 = arith.constant 0 : index
    %c0_12 = arith.constant 0 : index
    %18 = vector.load %arg3[%c0_11, %c0_12] : memref<96x96xf32, #tpu.memory_space<vmem>>, vector<96x96xf32>
    %19 = tpu.concatenate %15, %16, %17 in 0 : vector<32x16xf32>, vector<32x16xf32>, vector<32x16xf32> -> vector<96x16xf32>
    %cst_13 = arith.constant dense<0.000000e+00> : vector<96x16xf32>
    %20 = tpu.matmul %19, %2, %cst_13 {dimension_numbers = #tpu.dot_dimension_numbers<[1], [0], [0], [1], [0, 0, 1, 1], [], []>} : vector<96x16xf32>, vector<16x16xf32>, vector<96x16xf32> -> vector<96x16xf32>
    %cst_14 = arith.constant dense<0.000000e+00> : vector<96x16xf32>
    %21 = tpu.matmul %18, %20, %cst_14 {dimension_numbers = #tpu.dot_dimension_numbers<[1], [0], [0], [1], [0, 0, 1, 1], [], []>} : vector<96x96xf32>, vector<96x16xf32>, vector<96x16xf32> -> vector<96x16xf32>
    %22 = vector.extract_strided_slice %21 {offsets = [0, 0], sizes = [32, 16], strides = [1, 1]} : vector<96x16xf32> to vector<32x16xf32>
    %cst_15 = arith.constant 1.000000e+00 : f32
    %23 = vector.broadcast %cst_15 : f32 to vector<32x16xf32>
    %24 = arith.addf %22, %23 : vector<32x16xf32>
    %25 = vector.extract_strided_slice %21 {offsets = [32, 0], sizes = [32, 16], strides = [1, 1]} : vector<96x16xf32> to vector<32x16xf32>
    %cst_16 = arith.constant 1.000000e+00 : f32
    %26 = vector.broadcast %cst_16 : f32 to vector<32x16xf32>
    %27 = arith.addf %25, %26 : vector<32x16xf32>
    %28 = vector.extract_strided_slice %21 {offsets = [64, 0], sizes = [32, 16], strides = [1, 1]} : vector<96x16xf32> to vector<32x16xf32>
    %cst_17 = arith.constant 1.000000e+00 : f32
    %29 = vector.broadcast %cst_17 : f32 to vector<32x16xf32>
    %30 = arith.addf %28, %29 : vector<32x16xf32>
    %31 = arith.mulf %11, %12 : vector<32x16xf32>
    %cst_18 = arith.constant 1.000000e+00 : f32
    %32 = vector.broadcast %cst_18 : f32 to vector<32x16xf32>
    %33 = arith.addf %31, %32 : vector<32x16xf32>
    %34 = arith.mulf %11, %11 : vector<32x16xf32>
    %cst_19 = arith.constant 1.000000e+00 : f32
    %35 = vector.broadcast %cst_19 : f32 to vector<32x16xf32>
    %36 = arith.addf %34, %35 : vector<32x16xf32>
    %37 = arith.mulf %12, %12 : vector<32x16xf32>
    %cst_20 = arith.constant 1.000000e+00 : f32
    %38 = vector.broadcast %cst_20 : f32 to vector<32x16xf32>
    %39 = arith.addf %37, %38 : vector<32x16xf32>
    %40 = arith.addf %36, %39 : vector<32x16xf32>
    %cst_21 = arith.constant 2.000000e+00 : f32
    %41 = vector.broadcast %cst_21 : f32 to vector<32x16xf32>
    %42 = arith.mulf %41, %30 : vector<32x16xf32>
    %43 = vector.broadcast %1 : f32 to vector<32x16xf32>
    %44 = arith.addf %42, %43 : vector<32x16xf32>
    %cst_22 = arith.constant 2.000000e+00 : f32
    %45 = vector.broadcast %cst_22 : f32 to vector<32x16xf32>
    %46 = arith.mulf %45, %33 : vector<32x16xf32>
    %47 = arith.mulf %46, %46 : vector<32x16xf32>
    %48 = vector.broadcast %0 : f32 to vector<32x16xf32>
    %49 = arith.addf %47, %48 : vector<32x16xf32>
    %50 = arith.mulf %44, %49 : vector<32x16xf32>
    %51 = arith.addf %24, %27 : vector<32x16xf32>
    %52 = vector.broadcast %1 : f32 to vector<32x16xf32>
    %53 = arith.addf %51, %52 : vector<32x16xf32>
    %54 = arith.mulf %40, %40 : vector<32x16xf32>
    %55 = vector.broadcast %0 : f32 to vector<32x16xf32>
    %56 = arith.addf %54, %55 : vector<32x16xf32>
    %57 = arith.mulf %53, %56 : vector<32x16xf32>
    %58 = arith.divf %50, %57 : vector<32x16xf32>
    %59 = vector.shape_cast %58 : vector<32x16xf32> to vector<1x32x16xf32>
    %cst_23 = arith.constant dense<0.000000e+00> : vector<1xf32>
    %60 = vector.multi_reduction <add>, %59, %cst_23 [1, 2] : vector<1x32x16xf32> to vector<1xf32>
    %61 = vector.shape_cast %60 : vector<1xf32> to vector<1x1x1xf32>
    %62 = vector.extract %61[0, 0, 0] : f32 from vector<1x1x1xf32>
    %c0_24 = arith.constant 0 : index
    %c0_25 = arith.constant 0 : index
    %63 = memref.load %arg7[%c0_24, %c0_25] : memref<1x1xf32, #tpu.memory_space<smem>>
    memref.store %62, %arg7[%c0_24, %c0_25] : memref<1x1xf32, #tpu.memory_space<smem>>
    return
  }
  func.func @transform_0(%arg0: i32) -> i32 {
    %c0_i32 = arith.constant 0 : i32
    %c0_i32_0 = arith.constant 0 : i32
    return %c0_i32 : i32
  }
  func.func @transform_1(%arg0: i32) -> (i32, i32) {
    %c0_i32 = arith.constant 0 : i32
    %c0_i32_0 = arith.constant 0 : i32
    %c0_i32_1 = arith.constant 0 : i32
    return %c0_i32, %c0_i32_0 : i32, i32
  }
  func.func @transform_2(%arg0: i32) -> (i32, i32) {
    %c0_i32 = arith.constant 0 : i32
    %c0_i32_0 = arith.constant 0 : i32
    %c0_i32_1 = arith.constant 0 : i32
    return %c0_i32, %c0_i32_0 : i32, i32
  }
  func.func @transform_3(%arg0: i32) -> (i32, i32) {
    %c0_i32 = arith.constant 0 : i32
    %c0_i32_0 = arith.constant 0 : i32
    %c0_i32_1 = arith.constant 0 : i32
    return %c0_i32, %c0_i32_0 : i32, i32
  }
  func.func @transform_4(%arg0: i32) -> (i32, i32, i32) {
    %c0_i32 = arith.constant 0 : i32
    %c0_i32_0 = arith.constant 0 : i32
    %c0_i32_1 = arith.constant 0 : i32
    return %arg0, %c0_i32, %c0_i32_0 : i32, i32, i32
  }
  func.func @transform_5(%arg0: i32) -> (i32, i32, i32) {
    %c0_i32 = arith.constant 0 : i32
    %c0_i32_0 = arith.constant 0 : i32
    %c0_i32_1 = arith.constant 0 : i32
    return %arg0, %c0_i32, %c0_i32_0 : i32, i32, i32
  }
  func.func @transform_6(%arg0: i32) -> (i32, i32) {
    %c0_i32 = arith.constant 0 : i32
    %c0_i32_0 = arith.constant 0 : i32
    return %arg0, %c0_i32 : i32, i32
  }
}

</mosaic_0001>

<bundles_post_ra>
// kernel: tpu_custom_call.1
= control target key start
LH: loop header
LB: loop body
LE: loop exit
PB: predicated region body
PF: predicated region fallthrough
CT: control target
= control target key end

     0   :  { %11 = vsyncpa [#allocation4], 0  ;;  %s1127_s0 = inlined_call_operand.hbm [shape: f32[2], index: 0, kind: input, shape index: {}]   ;;  %s1128_s1 = inlined_call_operand.hbm [shape: f32[64,64], index: 1, kind: input, shape index: {}]   ;;  %s1129_s2 = inlined_call_operand.hbm [shape: f32[96,96], index: 2, kind: input, shape index: {}]   ;;  %s1130_s3 = inlined_call_operand.hbm [shape: f32[16,16], index: 3, kind: input, shape index: {}]   ;;  %s1131_s4 = inlined_call_operand.hbm [shape: f32[2,16,16], index: 4, kind: input, shape index: {}]   ;;  %s1132_s5 = inlined_call_operand.hbm [shape: f32[2,16,16], index: 5, kind: input, shape index: {}]   ;;  %s1133_s6 = inlined_call_operand.hbm [shape: f32[1,1], index: 6, kind: output, shape index: {}]  }
   0x1   :  { %12 = vsyncpa [#allocation3], 0 }
   0x2   :  { %13 = vsyncpa [#allocation8], 0 }
   0x3   :  { %14 = vsyncpa [#allocation11], 0 }
   0x4   :  { %15 = vsyncpa [#allocation5], 0  ;;  %s42_s23 = sshll.u32 %s1129_s2, 4  ;;  %s889_s24 = smov [#allocation7]   ;;  %s43_s23 = int_to_ptr.hbm [resolvable:$true] %s42_s23 }
   0x5   :  { %s44_s25 = sshll.u32 %s889_s24, 4  ;;  %s68_s28 = sshll.u32 %s1131_s4, 4  ;;  %s45_s25 = int_to_ptr.vmem [resolvable:$true] %s44_s25  ;;  %s69_s28 = int_to_ptr.hbm [resolvable:$true] %s68_s28 }
   0x6   :  { %s890_s29 = smov 128   ;;  %s891_s30 = smov 8  }
   0x7   :  { %50 = dma.hbm_to_vmem [thread:$0]  %s43_s23, 1536, %s45_s25, [#allocation8], %s890_s29, %s890_s29, %s891_s30  }
   0x8   :  { %s892_s7 = smov [#allocation10]   ;;  %s21_s2 = sshll.u32 %s1127_s0, 4  ;;  %s22_s2 = int_to_ptr.hbm [resolvable:$true] %s21_s2 }
   0x9   :  { %s70_s8 = sshll.u32 %s892_s7, 4  ;;  %s29_s12 = sshll.u32 %s1128_s1, 4  ;;  %s71_s8 = int_to_ptr.vmem [resolvable:$true] %s70_s8  ;;  %s30_s12 = int_to_ptr.hbm [resolvable:$true] %s29_s12 }
   0xa   :  { %76 = dma.hbm_to_vmem [thread:$0]  %s69_s28, 512, %s71_s8, [#allocation11], %s890_s29, %s890_s29, %s891_s30  }
   0xb   :  { %s893_s13 = smov [#allocation2]   ;;  %s894_s14 = smov [#allocation6]  }
   0xc   :  { %24 = dma.hbm_to_smem %s22_s2, 16, %s893_s13, [#allocation4]  }
   0xd   :  { %s31_s15 = sshll.u32 %s894_s14, 4  ;;  %s55_s18 = sshll.u32 %s1130_s3, 4  ;;  %s32_s15 = int_to_ptr.vmem [resolvable:$true] %s31_s15  ;;  %s56_s18 = int_to_ptr.hbm [resolvable:$true] %s55_s18 }
   0xe   :  { %37 = dma.hbm_to_vmem [thread:$0]  %s30_s12, 1024, %s32_s15, [#allocation3], %s890_s29, %s890_s29, %s891_s30  }
   0xf   :  { %s81_s20 = sshll.u32 %s1132_s5, 4  ;;  %s895_s1 = smov [#allocation9]   ;;  %s82_s20 = int_to_ptr.hbm [resolvable:$true] %s81_s20 }
  0x10   :  { %s57_s21 = sshll.u32 %s895_s1, 4  ;;  %s896_s22 = smov [#allocation12]   ;;  %s58_s21 = int_to_ptr.vmem [resolvable:$true] %s57_s21 }
  0x11   :  { %63 = dma.hbm_to_vmem [thread:$0]  %s56_s18, 256, %s58_s21, [#allocation8], %s890_s29, %s890_s29, %s891_s30  }
  0x12   :  { %s83_s3 = sshll.u32 %s896_s22, 4  ;;  %s84_s3 = int_to_ptr.vmem [resolvable:$true] %s83_s3 }
  0x13   :  { %89 = dma.hbm_to_vmem [thread:$0]  %s82_s20, 512, %s84_s3, [#allocation11], %s890_s29, %s890_s29, %s891_s30  }
  0x14   :  { %879 = dma.done.wait [#allocation4], 16  }
  0x15   :  { %880 = vsyncadd [#allocation4], 4294967280 }
  0x16   :  { %881 = dma.done.wait [#allocation3], 1024  }
  0x17   :  { %882 = vsyncadd [#allocation3], 4294966272 }
  0x18   :  { %883 = dma.done.wait [#allocation8], 1792  }
  0x19   :  { %884 = vsyncadd [#allocation8], 4294965504 }
  0x1a   :  { %885 = dma.done.wait [#allocation11], 1024  }
  0x1b   :  { %886 = vsyncadd [#allocation11], 4294966272 }
  0x1c   :  { %114 = sfence }
  0x1d   :  { %v118_v0 = vld [vmem:[#allocation9 + $0x8] sm:$0xff]  ;;  %v117_v1 = vld [vmem:[#allocation9] sm:$0xff]  ;;  %v119_v2 = vld [vmem:[#allocation10] sm:$0xff]  ;;  %vm135_vm0 = vcmask 130048   ;;  %vm201_vm1 = vcmask 523264   ;;  %vm388_vm2 = vcmask 785408  }
  0x1e   :  { %174 = vmatpush.msra.mxu0 %v118_v0  ;;  %702 = vmatpush.msra.mxu2 %v118_v0  ;;  %v120_v3 = vld [vmem:[#allocation10 + $0x8] sm:$0xff]  ;;  %v121_v4 = vld [vmem:[#allocation10 + $0x10] sm:$0xff]  ;;  %v122_v5 = vld [vmem:[#allocation10 + $0x18] sm:$0xff]  ;;  %s661_s5 = sld [smem:[#allocation2 + $0x1]]  ;;  %s647_s26 = sshll.u32 %s1133_s6, 4  ;;  %s648_s26 = int_to_ptr.hbm [resolvable:$true] %s647_s26 }
  0x1f   :  { %v123_v6 = vld [vmem:[#allocation12] sm:$0xff]  ;;  %v971_v7 = vld [vmem:[#allocation12 + $0x8] sm:$0xff]  ;;  %v975_v8 = vld [vmem:[#allocation12 + $0x10] sm:$0xff]  ;;  %s115_s23 = sld [smem:[#allocation2]]  ;;  %s897_s28 = smov [#allocation13]  }
  0x20   :  { %175 = vmatpush.msra.mxu0 %v117_v1  ;;  %703 = vmatpush.msra.mxu2 %v117_v1  ;;  %v979_v9 = vld [vmem:[#allocation12 + $0x18] sm:$0xff]  ;;  %v127_v18 = vld [vmem:[#allocation6] sm:$0xff]  ;;  %v129_v20 = vld [vmem:[#allocation6 + $0x10] sm:$0xff] }
  0x21   :  { %662 = vmatmul.msk.f32.vlgmr.msra.gmra.mxu0 %vm135_vm0, %v119_v2  ;;  %v128_v19 = vld [vmem:[#allocation6 + $0x8] sm:$0xff]  ;;  %v130_v21 = vld [vmem:[#allocation6 + $0x18] sm:$0xff]  ;;  %v131_v22 = vld [vmem:[#allocation6 + $0x20] sm:$0xff] }
  0x22   :  { %v132_v23 = vld [vmem:[#allocation6 + $0x28] sm:$0xff]  ;;  %v133_v24 = vld [vmem:[#allocation6 + $0x30] sm:$0xff]  ;;  %v134_v25 = vld [vmem:[#allocation6 + $0x38] sm:$0xff] }
  0x29   :  { %663 = vmatmul.msk.f32.gmra.mxu0 %vm135_vm0, %v120_v3 }
  0x31   :  { %664 = vmatmul.msk.f32.gmra.mxu0 %vm135_vm0, %v121_v4 }
  0x39   :  { %665 = vmatmul.msk.f32.gmra.mxu0 %vm135_vm0, %v122_v5 }
  0x41   :  { %666 = vmatmul.msk.f32.gmra.mxu0 %vm135_vm0, %v123_v6 }
  0x49   :  { %667 = vmatmul.msk.f32.gmra.mxu0 %vm135_vm0, %v971_v7 }
  0x51   :  { %668 = vmatmul.msk.f32.gmra.mxu0 %vm135_vm0, %v975_v8 }
  0x59   :  { %669 = vmatmul.msk.f32.gmra.mxu0 %vm135_vm0, %v979_v9 }
  0x9e   :  { %v177_v10 = vpop.f32.mrf.mxu0 }
  0xa6   :  { %v180_v11 = vpop.f32.mrf.mxu0 }
  0xae   :  { %v183_v12 = vpop.f32.mrf.mxu0 }
  0xb6   :  { %v186_v13 = vpop.f32.mrf.mxu0 }
  0xbe   :  { %v189_v14 = vpop.f32.mrf.mxu0 }
  0xc6   :  { %v192_v15 = vpop.f32.mrf.mxu0 }
  0xce   :  { %v195_v16 = vpop.f32.mrf.mxu0 }
  0xd6   :  { %v198_v17 = vpop.f32.mrf.mxu0 }
  0xd7   :  { %234 = vmatpush.msra.mxu1 %v198_v17 }
  0xd9   :  { %235 = vmatpush.msra.mxu1 %v195_v16 }
  0xdb   :  { %236 = vmatpush.msra.mxu1 %v192_v15 }
  0xdd   :  { %237 = vmatpush.msra.mxu1 %v189_v14 }
  0xdf   :  { %238 = vmatpush.msra.mxu1 %v186_v13 }
  0xe1   :  { %239 = vmatpush.msra.mxu1 %v183_v12 }
  0xe3   :  { %240 = vmatpush.msra.mxu1 %v180_v11 }
  0xe5   :  { %241 = vmatpush.msra.mxu1 %v177_v10 }
  0xe6   :  { %670 = vmatmul.msk.f32.vlgmr.msra.gmra.mxu1 %vm201_vm1, %v127_v18 }
  0xe7   :  { %349 = vmatpush.msrb.mxu1 %v118_v0 }
  0xe9   :  { %350 = vmatpush.msrb.mxu1 %v117_v1 }
  0xee   :  { %671 = vmatmul.msk.f32.gmra.mxu1 %vm201_vm1, %v128_v19  ;;  %v290_v19 = vld [vmem:[#allocation7 + $0x18] sm:$0xff] }
  0xf6   :  { %672 = vmatmul.msk.f32.gmra.mxu1 %vm201_vm1, %v129_v20  ;;  %v287_v20 = vld [vmem:[#allocation7] sm:$0xff] }
  0xfe   :  { %673 = vmatmul.msk.f32.gmra.mxu1 %vm201_vm1, %v130_v21 }
 0x106   :  { %674 = vmatmul.msk.f32.gmra.mxu1 %vm201_vm1, %v131_v22  ;;  %v291_v22 = vld [vmem:[#allocation7 + $0x20] sm:$0xff] }
 0x10e   :  { %675 = vmatmul.msk.f32.gmra.mxu1 %vm201_vm1, %v132_v23  ;;  %v288_v23 = vld [vmem:[#allocation7 + $0x8] sm:$0xff] }
 0x116   :  { %676 = vmatmul.msk.f32.gmra.mxu1 %vm201_vm1, %v133_v24  ;;  %v292_v24 = vld [vmem:[#allocation7 + $0x28] sm:$0xff] }
 0x11e   :  { %677 = vmatmul.msk.f32.gmra.mxu1 %vm201_vm1, %v134_v25  ;;  %v289_v25 = vld [vmem:[#allocation7 + $0x10] sm:$0xff] }
 0x163   :  { %v243_v26 = vpop.f32.mrf.mxu1 }
 0x164   :  { %v267_v27 = vsub.f32 %v119_v2, %v243_v26  ;;  %v498_v38 = vmul.f32 %v243_v26, %v243_v26 }
 0x166   :  { %v275_v28 = vmul.f32 %v267_v27, %v267_v27  ;;  %v502_v43 = vadd.f32 1.0, %v498_v38 }
 0x168   :  { %678 = vmatmul.msk.f32.vlgmr.msrb.gmra.mxu1 %vm135_vm0, %v275_v28  ;;  %v295_v28 = vld [vmem:[#allocation7 + $0x40] sm:$0xff] }
 0x16b   :  { %v246_v29 = vpop.f32.mrf.mxu1 }
 0x16c   :  { %v268_v30 = vsub.f32 %v120_v3, %v246_v29  ;;  %v499_v47 = vmul.f32 %v246_v29, %v246_v29 }
 0x16e   :  { %v276_v31 = vmul.f32 %v268_v30, %v268_v30  ;;  %v503_v52 = vadd.f32 1.0, %v499_v47 }
 0x170   :  { %679 = vmatmul.msk.f32.vlgmr.msra.gmra.mxu2 %vm135_vm0, %v276_v31  ;;  %v298_v31 = vld [vmem:[#allocation7 + $0x58] sm:$0xff] }
 0x173   :  { %v249_v32 = vpop.f32.mrf.mxu1 }
 0x174   :  { %v269_v33 = vsub.f32 %v121_v4, %v249_v32  ;;  %v500_v56 = vmul.f32 %v249_v32, %v249_v32 }
 0x176   :  { %v277_v34 = vmul.f32 %v269_v33, %v269_v33  ;;  %v504_v61 = vadd.f32 1.0, %v500_v56 }
 0x178   :  { %680 = vmatmul.msk.f32.gmra.mxu2 %vm135_vm0, %v277_v34 }
 0x17b   :  { %v994_v35 = vpop.f32.mrf.mxu1 }
 0x17c   :  { %v270_v36 = vsub.f32 %v122_v5, %v994_v35 }
 0x17e   :  { %v278_v37 = vmul.f32 %v270_v36, %v270_v36 }
 0x180   :  { %681 = vmatmul.msk.f32.gmra.mxu2 %vm135_vm0, %v278_v37 }
 0x183   :  { %v255_v39 = vpop.f32.mrf.mxu1 }
 0x184   :  { %v271_v40 = vsub.f32 %v123_v6, %v255_v39  ;;  %v998_v41 = vmul.f32 %v255_v39, %v243_v26  ;;  %v506_v42 = vmul.f32 %v255_v39, %v255_v39  ;;  %v293_v26 = vld [vmem:[#allocation7 + $0x30] sm:$0xff]  ;;  %v1038_v39 = vstv %s661_s5 }
 0x186   :  { %v510_v44 = vadd.f32 1.0, %v506_v42  ;;  %v279_v45 = vmul.f32 %v271_v40, %v271_v40  ;;  %v283_v4 = vmul.f32 %v271_v40, %v267_v27  ;;  %v294_v27 = vld [vmem:[#allocation7 + $0x38] sm:$0xff]  ;;  %v1040_v42 = vstv %s115_s23 }
 0x188   :  { %v1000_v46 = vadd.f32 %v510_v44, %v502_v43  ;;  %682 = vmatmul.msk.f32.gmra.mxu2 %vm135_vm0, %v279_v45 }
 0x18a   :  { %v552_v38 = vmul.f32 %v1000_v46, %v1000_v46 }
 0x18b   :  { %v258_v48 = vpop.f32.mrf.mxu1 }
 0x18c   :  { %v272_v49 = vsub.f32 %v971_v7, %v258_v48  ;;  %v1004_v50 = vmul.f32 %v258_v48, %v246_v29  ;;  %v507_v51 = vmul.f32 %v258_v48, %v258_v48  ;;  %v296_v29 = vld [vmem:[#allocation7 + $0x48] sm:$0xff]  ;;  %v556_v45 = vadd.f32 %v552_v38, %v1040_v42 }
 0x18e   :  { %v511_v53 = vadd.f32 1.0, %v507_v51  ;;  %v280_v54 = vmul.f32 %v272_v49, %v272_v49  ;;  %v284_v5 = vmul.f32 %v272_v49, %v268_v30  ;;  %v297_v30 = vld [vmem:[#allocation7 + $0x50] sm:$0xff] }
 0x190   :  { %v1006_v55 = vadd.f32 %v511_v53, %v503_v52  ;;  %683 = vmatmul.msk.f32.gmra.mxu2 %vm135_vm0, %v280_v54 }
 0x192   :  { %v553_v52 = vmul.f32 %v1006_v55, %v1006_v55 }
 0x193   :  { %v261_v57 = vpop.f32.mrf.mxu1 }
 0x194   :  { %v273_v58 = vsub.f32 %v975_v8, %v261_v57  ;;  %v1010_v59 = vmul.f32 %v261_v57, %v249_v32  ;;  %v508_v60 = vmul.f32 %v261_v57, %v261_v57  ;;  %v557_v57 = vadd.f32 %v553_v52, %v1040_v42 }
 0x196   :  { %v512_v62 = vadd.f32 1.0, %v508_v60  ;;  %v281_v63 = vmul.f32 %v273_v58, %v273_v58  ;;  %v285_v6 = vmul.f32 %v273_v58, %v269_v33  ;;  %v501_v60 = vmul.f32 %v994_v35, %v994_v35 }
 0x198   :  { %v1012_v0 = vadd.f32 %v512_v62, %v504_v61  ;;  %684 = vmatmul.msk.f32.gmra.mxu2 %vm135_vm0, %v281_v63 }
 0x19b   :  { %v1015_v1 = vpop.f32.mrf.mxu1 }
 0x19c   :  { %v274_v2 = vsub.f32 %v979_v9, %v1015_v1  ;;  %v509_v56 = vmul.f32 %v1015_v1, %v1015_v1 }
 0x19e   :  { %v282_v3 = vmul.f32 %v274_v2, %v274_v2  ;;  %v286_v7 = vmul.f32 %v274_v2, %v270_v36  ;;  %v554_v2 = vmul.f32 %v1012_v0, %v1012_v0 }
 0x1a0   :  { %685 = vmatmul.msk.f32.gmra.mxu2 %vm135_vm0, %v282_v3  ;;  %v513_v3 = vadd.f32 1.0, %v509_v56 }
 0x1a8   :  { %686 = vmatmul.msk.f32.gmra.mxu2 %vm135_vm0, %v283_v4 }
 0x1b0   :  { %687 = vmatmul.msk.f32.gmra.mxu2 %vm135_vm0, %v284_v5  ;;  %v505_v5 = vadd.f32 1.0, %v501_v60 }
 0x1b8   :  { %688 = vmatmul.msk.f32.gmra.mxu2 %vm135_vm0, %v285_v6 }
 0x1c0   :  { %689 = vmatmul.msk.f32.gmra.mxu2 %vm135_vm0, %v286_v7 }
 0x1e5   :  { %v352_v21 = vpop.f32.mrf.mxu1 }
 0x1f3   :  { %v355_v8 = vpop.f32.mrf.mxu2 }
 0x1fb   :  { %v358_v10 = vpop.f32.mrf.mxu2 }
 0x203   :  { %v361_v11 = vpop.f32.mrf.mxu2 }
 0x20b   :  { %v364_v12 = vpop.f32.mrf.mxu2 }
 0x213   :  { %v367_v9 = vpop.f32.mrf.mxu2 }
 0x21b   :  { %v370_v13 = vpop.f32.mrf.mxu2 }
 0x223   :  { %v373_v14 = vpop.f32.mrf.mxu2 }
 0x22b   :  { %v376_v15 = vpop.f32.mrf.mxu2 }
 0x233   :  { %v379_v16 = vpop.f32.mrf.mxu2 }
 0x23b   :  { %v382_v17 = vpop.f32.mrf.mxu2 }
 0x243   :  { %v385_v18 = vpop.f32.mrf.mxu2 }
 0x244   :  { %429 = vmatpush.msrb.mxu0 %v385_v18  ;;  %704 = vmatpush.msra.mxu3 %v385_v18 }
 0x246   :  { %430 = vmatpush.msrb.mxu0 %v382_v17  ;;  %705 = vmatpush.msra.mxu3 %v382_v17 }
 0x248   :  { %431 = vmatpush.msrb.mxu0 %v379_v16  ;;  %706 = vmatpush.msra.mxu3 %v379_v16 }
 0x24a   :  { %432 = vmatpush.msrb.mxu0 %v376_v15  ;;  %707 = vmatpush.msra.mxu3 %v376_v15 }
 0x24c   :  { %433 = vmatpush.msrb.mxu0 %v373_v14  ;;  %708 = vmatpush.msra.mxu3 %v373_v14 }
 0x24e   :  { %434 = vmatpush.msrb.mxu0 %v370_v13  ;;  %709 = vmatpush.msra.mxu3 %v370_v13 }
 0x250   :  { %435 = vmatpush.msrb.mxu0 %v367_v9  ;;  %710 = vmatpush.msra.mxu3 %v367_v9 }
 0x252   :  { %436 = vmatpush.msrb.mxu0 %v364_v12  ;;  %711 = vmatpush.msra.mxu3 %v364_v12 }
 0x254   :  { %437 = vmatpush.msrb.mxu0 %v361_v11  ;;  %712 = vmatpush.msra.mxu3 %v361_v11  ;;  %v494_v11 = vadd.f32 1.0, %v998_v41 }
 0x256   :  { %438 = vmatpush.msrb.mxu0 %v358_v10  ;;  %713 = vmatpush.msra.mxu3 %v358_v10  ;;  %v558_v10 = vadd.f32 %v554_v2, %v1040_v42  ;;  %v527_v18 = vmul.f32 2.0, %v494_v11 }
 0x258   :  { %439 = vmatpush.msrb.mxu0 %v355_v8  ;;  %714 = vmatpush.msra.mxu3 %v355_v8  ;;  %v517_v8 = vadd.f32 %v513_v3, %v505_v5 }
 0x25a   :  { %440 = vmatpush.msrb.mxu0 %v352_v21  ;;  %715 = vmatpush.msra.mxu3 %v352_v21  ;;  %v555_v16 = vmul.f32 %v517_v8, %v517_v8 }
 0x25b   :  { %693 = vmatmul.msk.f32.vlgmr.msra.gmra.mxu3 %vm388_vm2, %v290_v19  ;;  %690 = vmatmul.msk.f32.vlgmr.msrb.gmra.mxu0 %vm388_vm2, %v287_v20 }
 0x25c   :  { %v559_v41 = vadd.f32 %v555_v16, %v1040_v42 }
 0x263   :  { %694 = vmatmul.msk.f32.gmra.mxu3 %vm388_vm2, %v291_v22  ;;  %691 = vmatmul.msk.f32.gmra.mxu0 %vm388_vm2, %v288_v23  ;;  %v531_v22 = vmul.f32 %v527_v18, %v527_v18  ;;  %v495_v23 = vadd.f32 1.0, %v1004_v50 }
 0x265   :  { %v536_v50 = vadd.f32 %v1040_v42, %v531_v22 }
 0x26b   :  { %695 = vmatmul.msk.f32.gmra.mxu3 %vm388_vm2, %v292_v24  ;;  %692 = vmatmul.msk.f32.gmra.mxu0 %vm388_vm2, %v289_v25 }
 0x273   :  { %696 = vmatmul.msk.f32.gmra.mxu3 %vm388_vm2, %v293_v26 }
 0x27b   :  { %697 = vmatmul.msk.f32.gmra.mxu3 %vm388_vm2, %v294_v27 }
 0x283   :  { %698 = vmatmul.msk.f32.gmra.mxu3 %vm388_vm2, %v295_v28 }
 0x28b   :  { %699 = vmatmul.msk.f32.gmra.mxu3 %vm388_vm2, %v296_v29 }
 0x293   :  { %700 = vmatmul.msk.f32.gmra.mxu3 %vm388_vm2, %v297_v30 }
 0x29b   :  { %701 = vmatmul.msk.f32.gmra.mxu3 %vm388_vm2, %v298_v31 }
 0x2d8   :  { %v442_v33 = vpop.f32.mrf.mxu0 }
 0x2d9   :  { %v478_v34 = vadd.f32 1.0, %v442_v33  ;;  %v528_v33 = vmul.f32 2.0, %v495_v23 }
 0x2de   :  { %v451_v32 = vpop.f32.mrf.mxu3 }
 0x2df   :  { %v481_v13 = vadd.f32 1.0, %v451_v32 }
 0x2e0   :  { %v445_v40 = vpop.f32.mrf.mxu0 }
 0x2e1   :  { %v479_v47 = vadd.f32 1.0, %v445_v40 }
 0x2e6   :  { %v454_v36 = vpop.f32.mrf.mxu3 }
 0x2e7   :  { %v482_v37 = vadd.f32 1.0, %v454_v36 }
 0x2e8   :  { %v448_v46 = vpop.f32.mrf.mxu0 }
 0x2e9   :  { %v544_v43 = vadd.f32 %v482_v37, %v478_v34  ;;  %v480_v58 = vadd.f32 1.0, %v448_v46 }
 0x2eb   :  { %v548_v44 = vadd.f32 %v544_v43, %v1038_v39 }
 0x2ed   :  { %v1044_v48 = vmul.f32 %v556_v45, %v548_v44  ;;  %v532_v44 = vmul.f32 %v528_v33, %v528_v33  ;;  %v496_v45 = vadd.f32 1.0, %v1010_v59  ;;  %v493_v59 = vmul.f32 %v1015_v1, %v994_v35 }
 0x2ee   :  { %v457_v49 = vpop.f32.mrf.mxu3 }
 0x2ef   :  { %v483_v51 = vadd.f32 1.0, %v457_v49  ;;  %727 = vrcp.f32 %v1044_v48  ;;  %v575_v30 = vand.u32 2147483648, %v1044_v48  ;;  %vm569_vm4 = vweird.f32 %v1044_v48 }
 0x2f0   :  { %v573_v32 = vand.u32 2147483647, %v1044_v48  ;;  %v537_v60 = vadd.f32 %v1040_v42, %v532_v44  ;;  %v497_v5 = vadd.f32 1.0, %v493_v59 }
 0x2f1   :  { %v545_v53 = vadd.f32 %v483_v51, %v479_v47  ;;  %v576_v40 = vor.u32 1.1754944e-38, %v575_v30 }
 0x2f2   :  { %vm574_vm6 = vcmp.eq.f32.partialorder %v573_v32, 8.507059e+37 }
 0x2f3   :  { %v549_v54 = vadd.f32 %v545_v53, %v1038_v39 }
 0x2f5   :  { %v1055_v61 = vmul.f32 %v557_v57, %v549_v54  ;;  %v728_v55 = vpop.eup %727 }
 0x2f6   :  { %v460_v62 = vpop.f32.mrf.mxu3  ;;  %v565_v6 = vmul.f32 %v728_v55, %v1044_v48  ;;  %vm570_vm3 = vweird.f32 %v728_v55 }
 0x2f7   :  { %v484_v63 = vadd.f32 1.0, %v460_v62  ;;  %729 = vrcp.f32 %v1055_v61  ;;  %vm571_vm5 = vmor %vm569_vm4, %vm570_vm3  ;;  %v590_v54 = vand.u32 2147483648, %v1055_v61  ;;  %vm584_vm8 = vweird.f32 %v1055_v61 }
 0x2f8   :  { %v566_v0 = vsub.f32 1.0, %v565_v6  ;;  %v588_v57 = vand.u32 2147483647, %v1055_v61 }
 0x2f9   :  { %v546_v4 = vadd.f32 %v484_v63, %v480_v58  ;;  %v529_v58 = vmul.f32 2.0, %v496_v45  ;;  %v591_v3 = vor.u32 1.1754944e-38, %v590_v54 }
 0x2fa   :  { %v567_v21 = vmul.f32 %v728_v55, %v566_v0  ;;  %vm589_vm10 = vcmp.eq.f32.partialorder %v588_v57, 8.507059e+37 }
 0x2fb   :  { %v550_v7 = vadd.f32 %v546_v4, %v1038_v39 }
 0x2fc   :  { %v568_v27 = vadd.f32 %v728_v55, %v567_v21 }
 0x2fd   :  { %v1064_v12 = vmul.f32 %v558_v10, %v550_v7  ;;  %v1066_v15 = vpop.eup %729 }
 0x2fe   :  { %v463_v9 = vpop.f32.mrf.mxu3  ;;  %v580_v19 = vmul.f32 %v1066_v15, %v1055_v61  ;;  %v572_v36 = vsel %vm571_vm5, %v728_v55, %v568_v27  ;;  %vm585_vm7 = vweird.f32 %v1066_v15  ;;  %v533_v61 = vmul.f32 %v529_v58, %v529_v58 }
 0x2ff   :  { %v485_v14 = vadd.f32 1.0, %v463_v9  ;;  %731 = vrcp.f32 %v1064_v12  ;;  %v577_v48 = vsel %vm574_vm6, %v576_v40, %v572_v36  ;;  %vm586_vm9 = vmor %vm584_vm8, %vm585_vm7  ;;  %vm599_vm12 = vweird.f32 %v1064_v12 }
 0x300   :  { %v581_v28 = vsub.f32 1.0, %v580_v19  ;;  %v605_v11 = vand.u32 2147483648, %v1064_v12  ;;  %v538_v18 = vadd.f32 %v1040_v42, %v533_v61 }
 0x301   :  { %v547_v17 = vadd.f32 %v485_v14, %v481_v13  ;;  %v603_v13 = vand.u32 2147483647, %v1064_v12 }
 0x302   :  { %v582_v37 = vmul.f32 %v1066_v15, %v581_v28  ;;  %v606_v21 = vor.u32 1.1754944e-38, %v605_v11 }
 0x303   :  { %v551_v20 = vadd.f32 %v547_v17, %v1038_v39  ;;  %vm604_vm14 = vcmp.eq.f32.partialorder %v603_v13, 8.507059e+37 }
 0x304   :  { %v583_v52 = vadd.f32 %v1066_v15, %v582_v37 }
 0x305   :  { %v1074_v24 = vmul.f32 %v559_v41, %v551_v20  ;;  %v1076_v29 = vpop.eup %731 }
 0x306   :  { %v466_v25 = vpop.f32.mrf.mxu3  ;;  %v595_v38 = vmul.f32 %v1076_v29, %v1064_v12  ;;  %v587_v63 = vsel %vm586_vm9, %v1066_v15, %v583_v52  ;;  %vm600_vm11 = vweird.f32 %v1076_v29  ;;  %v530_v15 = vmul.f32 2.0, %v497_v5 }
 0x307   :  { %v486_v26 = vadd.f32 1.0, %v466_v25  ;;  %733 = vrcp.f32 %v1074_v24  ;;  %v592_v7 = vsel %vm589_vm10, %v591_v3, %v587_v63  ;;  %vm601_vm13 = vmor %vm599_vm12, %vm600_vm11  ;;  %v620_v28 = vand.u32 2147483648, %v1074_v24 }
 0x308   :  { %v596_v53 = vsub.f32 1.0, %v595_v38  ;;  %v534_v22 = vmul.f32 %v530_v15, %v530_v15  ;;  %vm614_vm1 = vweird.f32 %v1074_v24 }
 0x309   :  { %v518_v31 = vmul.f32 2.0, %v486_v26  ;;  %v621_v36 = vor.u32 1.1754944e-38, %v620_v28 }
 0x30a   :  { %v597_v55 = vmul.f32 %v1076_v29, %v596_v53 }
 0x30b   :  { %v523_v34 = vadd.f32 %v1038_v39, %v518_v31 }
 0x30c   :  { %v598_v8 = vadd.f32 %v1076_v29, %v597_v55 }
 0x30d   :  { %v540_v43 = vmul.f32 %v536_v50, %v523_v34  ;;  %v1090_v46 = vpop.eup %733  ;;  %v539_v50 = vadd.f32 %v1040_v42, %v534_v22 }
 0x30e   :  { %v469_v47 = vpop.f32.mrf.mxu3  ;;  %v610_v2 = vmul.f32 %v1090_v46, %v1074_v24  ;;  %v602_v19 = vsel %vm601_vm13, %v1076_v29, %v598_v8  ;;  %vm615_vm15 = vweird.f32 %v1090_v46  ;;  %v618_v29 = vand.u32 2147483647, %v1074_v24 }
 0x30f   :  { %v487_v49 = vadd.f32 1.0, %v469_v47  ;;  %v578_v51 = vmul.f32 %v577_v48, %v540_v43  ;;  %v607_v23 = vsel %vm604_vm14, %v606_v21, %v602_v19  ;;  %vm616_vm2 = vmor %vm614_vm1, %vm615_vm15 }
 0x310   :  { %v611_v10 = vsub.f32 1.0, %v610_v2  ;;  %vm619_vm3 = vcmp.eq.f32.partialorder %v618_v29, 8.507059e+37 }
 0x311   :  { %v519_v56 = vmul.f32 2.0, %v487_v49  ;;  %v624_v14 = vsel %vm135_vm0, %v578_v51, 0.0 }
 0x312   :  { %v612_v20 = vmul.f32 %v1090_v46, %v611_v10 }
 0x313   :  { %v524_v62 = vadd.f32 %v1038_v39, %v519_v56 }
 0x314   :  { %v613_v27 = vadd.f32 %v1090_v46, %v612_v20 }
 0x315   :  { %v541_v4 = vmul.f32 %v537_v60, %v524_v62 }
 0x316   :  { %v472_v6 = vpop.f32.mrf.mxu3  ;;  %v617_v34 = vsel %vm616_vm2, %v1090_v46, %v613_v27 }
 0x317   :  { %v488_v35 = vadd.f32 1.0, %v472_v6  ;;  %v593_v1 = vmul.f32 %v592_v7, %v541_v4  ;;  %v622_v38 = vsel %vm619_vm3, %v621_v36, %v617_v34 }
 0x319   :  { %v520_v9 = vmul.f32 2.0, %v488_v35  ;;  %v625_v0 = vsel %vm135_vm0, %v593_v1, 0.0 }
 0x31a   :  { %v626_v16 = vadd.f32 %v625_v0, %v624_v14 }
 0x31b   :  { %v525_v17 = vadd.f32 %v1038_v39, %v520_v9 }
 0x31d   :  { %v542_v41 = vmul.f32 %v538_v18, %v525_v17 }
 0x31e   :  { %v475_v12 = vpop.f32.mrf.mxu3 }
 0x31f   :  { %v489_v25 = vadd.f32 1.0, %v475_v12  ;;  %v608_v26 = vmul.f32 %v607_v23, %v542_v41 }
 0x321   :  { %v521_v30 = vmul.f32 2.0, %v489_v25  ;;  %v627_v31 = vsel %vm135_vm0, %v608_v26, 0.0 }
 0x322   :  { %v628_v32 = vadd.f32 %v627_v31, %v626_v16 }
 0x323   :  { %v526_v33 = vadd.f32 %v1038_v39, %v521_v30 }
 0x325   :  { %v543_v37 = vmul.f32 %v539_v50, %v526_v33 }
 0x327   :  { %v623_v40 = vmul.f32 %v622_v38, %v543_v37 }
 0x329   :  { %v629_v43 = vsel %vm135_vm0, %v623_v40, 0.0 }
 0x32a   :  { %v630_v44 = vadd.f32 %v629_v43, %v628_v32 }
 0x32c   :  { %631 = vadd.xlane.f32.xlu0 %v630_v44 }
 0x39f   :  { %v632_v24 = vpop.xlane.xlu0 %631 }
 0x3a0   :  { %v633_v45 = vrot.slane %v632_v24, 4 }
 0x3a2   :  { %v634_v47 = vadd.f32 %v633_v45, %v632_v24 }
 0x3a4   :  { %v635_v48 = vrot.slane %v634_v47, 2 }
 0x3a6   :  { %v636_v49 = vadd.f32 %v635_v48, %v634_v47 }
 0x3a8   :  { %v637_v51 = vrot.slane %v636_v49, 1 }
 0x3aa   :  { %v638_v39 = vadd.f32 %v637_v51, %v636_v49 }
 0x3ac   :  { %716 = vpush %v638_v39 }
 0x3dd   :  { %s717_s27 = spop %716 }
 0x3de   :  { %641 = sst [smem:[#allocation13]] %s717_s27 }
 0x3df   :  { %650 = dma.smem_to_hbm %s897_s28, 16, %s648_s26, [#allocation5]  }
 0x3e0   :  { %887 = dma.done.wait [#allocation5], 16  }
 0x3e1   :  { %888 = vsyncadd [#allocation5], 4294967280 }
 0x3e2   :  { %655 = sfence }
 0x3e3   :  { %656 = vsyncpa [#allocation3], 1 }
 0x3e4   :  { %657 = vsyncpa [#allocation8], 1 }
 0x3e5   :  { %658 = vsyncpa [#allocation11], 1 }
 0x3e6   :  { %659 = vsyncpa [#allocation4], 1 }
 0x3e7   :  { %660 = vsyncpa [#allocation5], 1 }

</bundles_post_ra>
